<compile_context>
chip_gen: v7x
topology: tpu7x:2x2x1
jax: 0.10.0
libtpu: 0.0.40
codegen_flags: <defaults>
</compile_context>

<pallas_src>
import math

import jax
import jax.numpy as jnp
from jax.experimental import pallas as pl
from jax.experimental.pallas import tpu as pltpu

_LANES = 128
_XCOLS = _LANES // 8          # 16 x values per 128-wide output-slab row
_MAX_TILE_ROWS = 8192         # slab rows / grid step: 4 MiB f32 output block
_VMEM_LIMIT = 32 << 20        # raise v5e's 16 MiB scoped default; fine on v6e/v7x


def _round_up(a, b):
    return ((a + b - 1) // b) * b


def _embed_kernel(x_ref, m_ref, b_ref, o_ref):
    # x_ref: (TR, 16)  m_ref: (16, 128)  b_ref: (1, 128)  o_ref: (TR, 128)
    # out[r, l] = relu(x[r, l // 8] * w[l % 8] + b[l % 8])
    # MXU is idle relative to the HBM write stream, so this tiny K=16 matmul
    # is free; default f32 precision already passes 1e-5 tolerances.
    y = jnp.dot(x_ref[...], m_ref[...], preferred_element_type=jnp.float32)
    o_ref[...] = jnp.maximum(y + b_ref[...], 0.0)


def embedding_vector_forward(x, weight, bias):
    """x: [..., 1] f32 -> relu(x @ W^T + b): [..., 8] f32."""
    orig_shape = x.shape
    assert orig_shape[-1] == 1, "EmbeddingVector expects last dim == 1"
    n = math.prod(orig_shape[:-1]) if len(orig_shape) > 1 else 1

    # Lane-dense slab layout. Pad x by at most 15 elements (to a multiple of
    # 16); the output slab is NOT padded to a tile multiple -- Pallas masks
    # the ragged last block.
    rows = pl.cdiv(n, _XCOLS)
    n16 = rows * _XCOLS

    # Largest tile within the VMEM budget, but keep >= 2 grid steps when
    # possible so both v7x TensorCores share the write stream (no-op on
    # single-TC v5e/v6e). tile_rows is always a multiple of 8.
    tile_rows = min(_MAX_TILE_ROWS, _round_up(pl.cdiv(rows, 2), 8))
    grid = (pl.cdiv(rows, tile_rows),)

    x_flat = x.reshape(-1).astype(jnp.float32)
    if n16 != n:
        x_flat = jnp.pad(x_flat, (0, n16 - n))
    x_slab = x_flat.reshape(rows, _XCOLS)

    # Fused lane-expansion / scale matrix and 128-wide tiled bias (computed
    # once in the wrapper; constant index_map -> not re-fetched per grid step).
    w_vec = weight.reshape(8).astype(jnp.float32)
    m = (jnp.eye(_XCOLS, dtype=jnp.float32)[:, :, None]
         * w_vec[None, None, :]).reshape(_XCOLS, _LANES)
    b_tiled = jnp.tile(bias.reshape(1, 8).astype(jnp.float32),
                       (1, _XCOLS)).reshape(1, _LANES)

    out_slab = pl.pallas_call(
        _embed_kernel,
        out_shape=jax.ShapeDtypeStruct((rows, _LANES), jnp.float32),
        grid_spec=pltpu.PrefetchScalarGridSpec(
            num_scalar_prefetch=0,
            grid=grid,
            in_specs=[
                pl.BlockSpec((tile_rows, _XCOLS), lambda i: (i, 0)),
                pl.BlockSpec((_XCOLS, _LANES), lambda i: (0, 0)),
                pl.BlockSpec((1, _LANES), lambda i: (0, 0)),
            ],
            out_specs=pl.BlockSpec((tile_rows, _LANES), lambda i: (i, 0)),
        ),
        compiler_params=pltpu.CompilerParams(
            dimension_semantics=("parallel",),
            vmem_limit_bytes=_VMEM_LIMIT,
        ),
        cost_estimate=pl.CostEstimate(
            flops=16 * n,                       # 8 mul + 8 add per x value
            transcendentals=0,
            bytes_accessed=n * 4 + n16 * 8 * 4,  # HBM-write-bound
        ),
    )(x_slab, m, b_tiled)

    # (rows, 128) and (rows*16, 8) share the same row-major layout: free reshape.
    y = out_slab.reshape(n16, 8)
    if n16 != n:
        y = y[:n]                 # trim only the <=15-element padded tail
    return y.reshape(*orig_shape[:-1], 8)


if __name__ == "__main__":
    key = jax.random.PRNGKey(0)
    kx1, kx2, kx3, kx4, kw, kb = jax.random.split(key, 6)

    # Parameters matching nn.Linear(1, 8): weight (out, in), bias (out,).
    weight = jax.random.normal(kw, (8, 1), dtype=jnp.float32)
    bias = jax.random.normal(kb, (8,), dtype=jnp.float32)

    def ref_fn(x):
        # y[..., o] = relu(x[..., 0] * w[o] + b[o])
        return jnp.maximum(x * weight.reshape(8) + bias, 0.0)

    # 1) Small canonical shape: batch=2, seq=8, features=1.
    x1 = jax.random.normal(kx1, (2, 8, 1), dtype=jnp.float32)
    y1 = jax.block_until_ready(embedding_vector_forward(x1, weight, bias))
    assert y1.shape == (2, 8, 8)
    assert jnp.allclose(y1, ref_fn(x1), atol=1e-5, rtol=1e-5)

    # 2) N not a multiple of 16 -> exercises the <=15-element padding/trim path.
    x2 = jax.random.normal(kx2, (3, 7, 1), dtype=jnp.float32)
    y2 = jax.block_until_ready(embedding_vector_forward(x2, weight, bias))
    assert y2.shape == (3, 7, 8)
    assert jnp.allclose(y2, ref_fn(x2), atol=1e-5, rtol=1e-5)

    # 3) Larger N -> exercises the multi-step (pipelined, parallel) grid.
    x3 = jax.random.normal(kx3, (4, 8192, 1), dtype=jnp.float32)
    y3 = jax.block_until_ready(embedding_vector_forward(x3, weight, bias))
    assert y3.shape == (4, 8192, 8)
    assert jnp.allclose(y3, ref_fn(x3), atol=1e-5, rtol=1e-5)

    # 4) Rows not a multiple of tile_rows -> exercises the ragged last block.
    x4 = jax.random.normal(kx4, (5, 1000, 1), dtype=jnp.float32)
    y4 = jax.block_until_ready(embedding_vector_forward(x4, weight, bias))
    assert y4.shape == (5, 1000, 8)
    assert jnp.allclose(y4, ref_fn(x4), atol=1e-5, rtol=1e-5)

    print("KERNEL_OK")
</pallas_src>

<mosaic_0001>
module attributes {stable_mosaic.version = 11 : i64} {
  func.func @_embed_kernel(%arg0: i32, %arg1: memref<8x16xf32, #tpu.memory_space<vmem>>, %arg2: memref<16x128xf32, #tpu.memory_space<vmem>>, %arg3: memref<1x128xf32, #tpu.memory_space<vmem>>, %arg4: memref<8x128xf32, #tpu.memory_space<vmem>>) attributes {dimension_semantics = [#tpu.dimension_semantics<parallel>], iteration_bounds = array<i64: 1>, scalar_prefetch = 0 : i64, scratch_operands = 0 : i64, tpu.core_type = #tpu.core_type<tc>, window_params = [{transform_indices = @transform_0, window_bounds = array<i64: 8, 16>}, {pipeline_mode = #tpu.pipeline_mode<synchronous>, transform_indices = @transform_1, window_bounds = array<i64: 16, 128>}, {pipeline_mode = #tpu.pipeline_mode<synchronous>, transform_indices = @transform_2, window_bounds = array<i64: 1, 128>}, {transform_indices = @transform_3, window_bounds = array<i64: 8, 128>}]} {
    %c0 = arith.constant 0 : index
    %c0_0 = arith.constant 0 : index
    %0 = vector.load %arg1[%c0, %c0_0] : memref<8x16xf32, #tpu.memory_space<vmem>>, vector<8x16xf32>
    %c0_1 = arith.constant 0 : index
    %c0_2 = arith.constant 0 : index
    %1 = vector.load %arg2[%c0_1, %c0_2] : memref<16x128xf32, #tpu.memory_space<vmem>>, vector<16x128xf32>
    %cst = arith.constant dense<0.000000e+00> : vector<8x128xf32>
    %2 = tpu.matmul %0, %1, %cst {dimension_numbers = #tpu.dot_dimension_numbers<[1], [0], [0], [1], [0, 0, 1, 1], [], []>} : vector<8x16xf32>, vector<16x128xf32>, vector<8x128xf32> -> vector<8x128xf32>
    %c0_3 = arith.constant 0 : index
    %c0_4 = arith.constant 0 : index
    %3 = vector.load %arg3[%c0_3, %c0_4] : memref<1x128xf32, #tpu.memory_space<vmem>>, vector<1x128xf32>
    %4 = vector.broadcast %3 : vector<1x128xf32> to vector<8x128xf32>
    %5 = arith.addf %2, %4 : vector<8x128xf32>
    %cst_5 = arith.constant 0.000000e+00 : f32
    %6 = vector.broadcast %cst_5 : f32 to vector<8x128xf32>
    %7 = arith.maximumf %5, %6 : vector<8x128xf32>
    %c0_6 = arith.constant 0 : index
    %c0_7 = arith.constant 0 : index
    %8 = vector.load %arg4[%c0_6, %c0_7] : memref<8x128xf32, #tpu.memory_space<vmem>>, vector<8x128xf32>
    tpu.vector_store %arg4[%c0_6, %c0_7], %7 {strides = array<i32>} : memref<8x128xf32, #tpu.memory_space<vmem>>, vector<8x128xf32>,
    return
  }
  func.func @transform_0(%arg0: i32) -> (i32, i32) {
    %c0_i32 = arith.constant 0 : i32
    %c0_i32_0 = arith.constant 0 : i32
    return %arg0, %c0_i32 : i32, i32
  }
  func.func @transform_1(%arg0: i32) -> (i32, i32) {
    %c0_i32 = arith.constant 0 : i32
    %c0_i32_0 = arith.constant 0 : i32
    %c0_i32_1 = arith.constant 0 : i32
    return %c0_i32, %c0_i32_0 : i32, i32
  }
  func.func @transform_2(%arg0: i32) -> (i32, i32) {
    %c0_i32 = arith.constant 0 : i32
    %c0_i32_0 = arith.constant 0 : i32
    %c0_i32_1 = arith.constant 0 : i32
    return %c0_i32, %c0_i32_0 : i32, i32
  }
  func.func @transform_3(%arg0: i32) -> (i32, i32) {
    %c0_i32 = arith.constant 0 : i32
    %c0_i32_0 = arith.constant 0 : i32
    return %arg0, %c0_i32 : i32, i32
  }
}

</mosaic_0001>

<bundles_post_ra>
// kernel: tpu_custom_call.1
= control target key start
LH: loop header
LB: loop body
LE: loop exit
PB: predicated region body
PF: predicated region fallthrough
CT: control target
= control target key end

     0   :  { %8 = vsyncpa [#allocation3], 0  ;;  %s319_s0 = inlined_call_operand.hbm [shape: f32[1,16], index: 0, kind: input, shape index: {}]   ;;  %s320_s1 = inlined_call_operand.hbm [shape: f32[16,128], index: 1, kind: input, shape index: {}]   ;;  %s321_s2 = inlined_call_operand.vmem [shape: f32[1,128], index: 2, kind: input, shape index: {}]   ;;  %s322_s3 = inlined_call_operand.hbm [shape: f32[1,128], index: 3, kind: output, shape index: {}]  }
   0x1   :  { %9 = vsyncpa [#allocation6], 0 }
   0x2   :  { %10 = vsyncpa [#allocation4], 0 }
   0x3   :  { %15 = vsyncadd [#allocation3], 112  ;;  %s244_s12 = smov [#allocation2]   ;;  %s172_s16 = scalar_lea.hbm %s319_s0, 16 }
   0x4   :  { %s16_s13 = sshll.u32 %s244_s12, 4  ;;  %p173_p0 = scmp.ne.s32.totalorder %s319_s0, %s172_s16  ;;  %s17_s13 = int_to_ptr.vmem [resolvable:$true] %s16_s13 }
   0x5   :  { %p176_p1 = scmp.lt.u32.totalorder %s172_s16, %s319_s0 }
   0x7   :  { %p178_p2 = pnand %p176_p1, %p173_p0 }
   0x9   :  { %181 = shalt.err (!%p178_p2)
}
   0xa   :  { %s182_s21 = scalar_lea.vmem %s17_s13, 16  ;;  %s186_s22 = scalar_lea.vmem %s17_s13, 128 }
   0xb   :  { %p183_p3 = scmp.ne.s32.totalorder %s17_s13, %s182_s21  ;;  %p187_p4 = scmp.lt.s32.totalorder %s17_s13, %s17_s13 }
   0xc   :  { %p188_p5 = scmp.lt.s32.totalorder %s186_s22, %s182_s21 }
   0xe   :  { %p189_p6 = por %p188_p5, %p187_p4 }
  0x10   :  { %p190_p7 = pnand %p189_p6, %p183_p3 }
  0x12   :  { %193 = shalt.err (!%p190_p7)
}
  0x13   :  { %s245_s23 = smov 16   ;;  %s246_s24 = smov 1  }
  0x14   :  { %22 = dma.hbm_to_vmem [thread:$0]  %s319_s0, 16, %s17_s13, [#allocation3], %s245_s23, %s245_s23, %s246_s24  }
  0x15   :  { %s247_s27 = smov [#allocation5]   ;;  %s194_s4 = scalar_lea.hbm %s320_s1, 256 }
  0x16   :  { %s28_s28 = sshll.u32 %s247_s27, 4  ;;  %p195_p8 = scmp.ne.s32.totalorder %s320_s1, %s194_s4  ;;  %s29_s28 = int_to_ptr.vmem [resolvable:$true] %s28_s28 }
  0x17   :  { %p198_p9 = scmp.lt.u32.totalorder %s194_s4, %s320_s1 }
  0x19   :  { %p200_p10 = pnand %p198_p9, %p195_p8 }
  0x1b   :  { %203 = shalt.err (!%p200_p10)
}
  0x1c   :  { %s204_s9 = scalar_lea.vmem %s29_s28, 256  ;;  %p209_p12 = scmp.lt.s32.totalorder %s29_s28, %s29_s28 }
  0x1d   :  { %p205_p11 = scmp.ne.s32.totalorder %s29_s28, %s204_s9  ;;  %p210_p13 = scmp.lt.s32.totalorder %s204_s9, %s204_s9 }
  0x1f   :  { %p211_p0 = por %p210_p13, %p209_p12 }
  0x21   :  { %p212_p1 = pnand %p211_p0, %p205_p11 }
  0x23   :  { %215 = shalt.err (!%p212_p1)
}
  0x24   :  { %s248_s0 = smov 128   ;;  %s249_s10 = smov 8  }
  0x25   :  { %34 = dma.hbm_to_vmem [thread:$0]  %s320_s1, 256, %s29_s28, [#allocation6], %s248_s0, %s248_s0, %s249_s10  }
  0x26   :  { %238 = dma.done.wait [#allocation3], 128  }
  0x27   :  { %239 = vsyncadd [#allocation3], 4294967168 }
  0x28   :  { %240 = dma.done.wait [#allocation6], 256  }
  0x29   :  { %241 = vsyncadd [#allocation6], 4294967040  ;;  %v250_v0 = vmov 0.0|0.0   ;;  %vm251_vm0 = vmmov 0   ;;  %v252_v1 = vmov 0.0   ;;  %v44_v2 = vld [vmem:[#allocation5] sm:$0xff] }
  0x2a   :  { %159 = vmatprep.subr.bf16.mxu0 %v250_v0  ;;  %156 = vmatprep.mubr.msk.f32.mxu0 %vm251_vm0, %v252_v1  ;;  %v45_v3 = vld [vmem:[#allocation5 + $0x8] sm:$0xff]  ;;  %v43_v5 = vld [vmem:[#allocation2] sm:$0xff]  ;;  %vm53_vm1 = vcmask 130048  }
  0x2b   :  { %v160_v4 = vpack.c.bf16 %v45_v3, %v44_v2  ;;  %v147_v6 = vld [vmem:[%s321_s2] ss:$0 sm:$0xff] }
  0x2d   :  { %161 = vmatpush3.bf16.msra.mxu0 %v160_v4 }
  0x30   :  { %157 = vmatmul.mubr.msk.f32.vlgmr.msra.gmra.mrb[0].mxu0 %vm53_vm1, %v43_v5 }
 0x103   :  { %v123_v7 = vpop.f32.mrb[0].mxu0 }
 0x104   :  { %v124_v8 = vadd.f32 %v147_v6, %v123_v7  ;;  %v158_v9 = vpop.f32.mrb[1].mxu0 }
 0x106   :  { %v127_v10 = vmax.f32 %v124_v8, 0.0 }
 0x108   :  { %128 = vst [vmem:[#allocation7] sm:$0xff] %v127_v10 }
 0x109   :  { %133 = vsyncadd [#allocation4], 112  ;;  %s253_s1 = smov [#allocation7]  }
 0x10a   :  { %s134_s15 = sshll.u32 %s253_s1, 4  ;;  %s135_s15 = int_to_ptr.vmem [resolvable:$true] %s134_s15 }
 0x10b   :  { %s216_s16 = scalar_lea.vmem %s135_s15, 16  ;;  %s220_s17 = scalar_lea.vmem %s135_s15, 128 }
 0x10c   :  { %p217_p2 = scmp.ne.s32.totalorder %s135_s15, %s216_s16  ;;  %p221_p3 = scmp.lt.s32.totalorder %s135_s15, %s135_s15 }
 0x10d   :  { %p222_p4 = scmp.lt.s32.totalorder %s220_s17, %s216_s16 }
 0x10f   :  { %p223_p5 = por %p222_p4, %p221_p3 }
 0x111   :  { %p224_p6 = pnand %p223_p5, %p217_p2 }
 0x113   :  { %227 = shalt.err (!%p224_p6)
}
 0x114   :  { %s228_s2 = scalar_lea.hbm %s322_s3, 16 }
 0x115   :  { %p229_p7 = scmp.ne.s32.totalorder %s322_s3, %s228_s2  ;;  %p232_p8 = scmp.lt.u32.totalorder %s228_s2, %s322_s3 }
 0x117   :  { %p234_p9 = pnand %p232_p8, %p229_p7 }
 0x119   :  { %237 = shalt.err (!%p234_p9)
}
 0x11a   :  { %140 = dma.vmem_to_hbm [thread:$0]  %s135_s15, 16, %s322_s3, [#allocation4], %s245_s23, %s245_s23, %s246_s24  }
 0x11b   :  { %242 = dma.done.wait [#allocation4], 128  }
 0x11c   :  { %243 = vsyncadd [#allocation4], 4294967168 }
 0x11d   :  { %144 = vsyncpa [#allocation3], 1 }
 0x11e   :  { %145 = vsyncpa [#allocation6], 1 }
 0x11f   :  { %146 = vsyncpa [#allocation4], 1 }

</bundles_post_ra>
